<compile_context>
chip_gen: v6e
topology: v6e:2x2x1
jax: 0.10.0
libtpu: 0.0.40
codegen_flags: <defaults>
</compile_context>

<pallas_src>
import numpy as np
import jax
import jax.numpy as jnp
from jax import lax
from jax.experimental import pallas as pl
from jax.experimental.pallas import tpu as pltpu


def self_attention_forward(x, wq, bq, wk, bk, wv, bv, gamma):
    """x: (N, C, H, W) f32; wq/wk: (Ci, C); bq/bk: (Ci,); wv: (C, C); bv: (C,);
    gamma: (1,).  Returns (N, C, H, W), matching the PyTorch forward."""
    N, C, H, W = x.shape
    HW = H * W
    Ca = C + 1                        # channels + ones row (bias folding)
    Cp = 8 * ((Ca + 7) // 8)          # sublane-aligned augmented channel dim
    f32 = jnp.float32
    hi = lax.Precision.HIGHEST

    # ---- wrapper-side precompute (tiny; done once per call) -----------------
    # Augmented, lane-dense input: rows [x ; ones ; zero-pad] -> (N, Cp, HW).
    x_flat = x.reshape(N, C, HW).astype(f32)
    x_aug = jnp.concatenate(
        [x_flat,
         jnp.ones((N, 1, HW), f32),
         jnp.zeros((N, Cp - Ca, HW), f32)], axis=1)

    # Algebraic q/k fusion: energy = x_aug^T (Wq_aug^T Wk_aug) x_aug.
    wq_aug = jnp.concatenate([wq, bq[:, None]], axis=1).astype(f32)   # (Ci, Ca)
    wk_aug = jnp.concatenate([wk, bk[:, None]], axis=1).astype(f32)   # (Ci, Ca)
    a_mat = jnp.dot(wq_aug.T, wk_aug, precision=hi)                   # (Ca, Ca)
    a_mat = jnp.pad(a_mat, ((0, Cp - Ca), (0, Cp - Ca))).astype(jnp.bfloat16)

    # Value weights with bias folded, plus a ones-passthrough row (row C) so the
    # softmax denominator drops out of the value matmul in (1, HW) lane layout.
    wv_aug = jnp.concatenate([wv, bv[:, None]], axis=1).astype(f32)   # (C, Ca)
    wv_rows = jnp.pad(wv_aug, ((0, 0), (0, Cp - Ca)))                 # (C, Cp)
    ones_pick = jnp.zeros((1, Cp), f32).at[0, C].set(1.0)             # selects ones row
    wv_full = jnp.concatenate(
        [wv_rows, ones_pick, jnp.zeros((Cp - C - 1, Cp), f32)],
        axis=0).astype(jnp.bfloat16)                                  # (Cp, Cp)

    gamma1 = jnp.reshape(gamma, (1,)).astype(f32)

    # ---- kernel --------------------------------------------------------------
    def kernel(xa_ref, a_ref, wv_ref, gamma_ref, o_ref):
        xa_f32 = xa_ref[...]                               # (Cp, HW) f32
        xa = xa_f32.astype(jnp.bfloat16)                   # bf16 MXU operand

        # t = A @ x_aug                                     (Cp, HW), f32 acc
        t = jnp.dot(a_ref[...], xa, preferred_element_type=jnp.float32)

        # energy[p, s] = sum_i xa[i, p] * t[i, s]  -- "TN" dot, no q/k transpose.
        energy = lax.dot_general(
            xa, t.astype(jnp.bfloat16),
            dimension_numbers=(((0,), (0,)), ((), ())),
            preferred_element_type=jnp.float32)            # (HW, HW) f32

        # Numerically-stable, UN-normalized softmax numerator (f32 exp on EUP).
        m = jnp.max(energy, axis=-1, keepdims=True)        # (HW, 1)
        e = jnp.exp(energy - m).astype(jnp.bfloat16)       # (HW, HW) bf16

        # v_full = Wv_full @ x_aug : rows 0..C-1 = value projection (+bias),
        # row C = exact ones (denominator passthrough), rest zeros.
        v_full = jnp.dot(wv_ref[...], xa, preferred_element_type=jnp.float32)
        v_bf = v_full.astype(jnp.bfloat16)                 # (Cp, HW)

        # out_aug[c, p] = sum_s v_full[c, s] * e[p, s]  -- "NT" dot, no att.T.
        out_aug = lax.dot_general(
            v_bf, e,
            dimension_numbers=(((1,), (1,)), ((), ())),
            preferred_element_type=jnp.float32)            # (Cp, HW) f32

        num = out_aug[0:C, :]                              # (C, HW) unnormalized out
        den = out_aug[C:C + 1, :]                          # (1, HW) softmax denom
        out = num * pl.reciprocal(den, approx=True)        # deferred normalization

        o_ref[...] = (gamma_ref[0] * out + xa_f32[0:C, :]).astype(o_ref.dtype)

    out_flat = pl.pallas_call(
        kernel,
        out_shape=jax.ShapeDtypeStruct((N, C, HW), x.dtype),
        grid=(N,),
        in_specs=[
            pl.BlockSpec((None, Cp, HW), lambda b: (b, 0, 0)),   # x_aug (batch squeezed)
            pl.BlockSpec((Cp, Cp), lambda b: (0, 0)),            # fused q/k matrix A
            pl.BlockSpec((Cp, Cp), lambda b: (0, 0)),            # value weights + ones row
            pl.BlockSpec(memory_space=pltpu.MemorySpace.SMEM),   # gamma scalar
        ],
        out_specs=pl.BlockSpec((None, C, HW), lambda b: (b, 0, 0)),
        compiler_params=pltpu.CompilerParams(
            # Batch elements are independent: v7x's 2 TensorCores each take one;
            # on single-TC v5e/v6e the constant-index weight blocks are not re-DMA'd.
            dimension_semantics=("parallel",),
        ),
    )(x_aug, a_mat, wv_full, gamma1)

    return out_flat.reshape(N, C, H, W)


def self_attention_ref(x, wq, bq, wk, bk, wv, bv, gamma):
    """Pure-JAX reference matching the PyTorch forward (f32, exact softmax)."""
    N, C, H, W = x.shape
    HW = H * W
    hi = lax.Precision.HIGHEST
    xf = x.reshape(N, C, HW)
    q = jnp.einsum('ic,ncp->nip', wq, xf, precision=hi) + bq[None, :, None]   # (N, Ci, HW)
    k = jnp.einsum('ic,ncp->nip', wk, xf, precision=hi) + bk[None, :, None]
    v = jnp.einsum('oc,ncp->nop', wv, xf, precision=hi) + bv[None, :, None]   # (N, C, HW)
    energy = jnp.einsum('nip,nis->nps', q, k, precision=hi)                   # (N, HW, HW)
    att = jax.nn.softmax(energy, axis=-1)
    out = jnp.einsum('ncs,nps->ncp', v, att, precision=hi)                    # (N, C, HW)
    return (gamma[0] * out + xf).reshape(N, C, H, W)


if __name__ == "__main__":
    N, C, H, W = 2, 32, 16, 16
    Ci = max(C // 8, 1)

    key = jax.random.PRNGKey(0)
    kx, k1, k2, k3, k4, k5, k6 = jax.random.split(key, 7)
    x = jax.random.normal(kx, (N, C, H, W), dtype=jnp.float32)
    wq = jax.random.normal(k1, (Ci, C), dtype=jnp.float32) * 0.1
    bq = jax.random.normal(k2, (Ci,), dtype=jnp.float32) * 0.1
    wk = jax.random.normal(k3, (Ci, C), dtype=jnp.float32) * 0.1
    bk = jax.random.normal(k4, (Ci,), dtype=jnp.float32) * 0.1
    wv = jax.random.normal(k5, (C, C), dtype=jnp.float32) * 0.1
    bv = jax.random.normal(k6, (C,), dtype=jnp.float32) * 0.1
    # PyTorch initializes gamma to 0 (which makes out == x); use a nonzero value
    # so the attention path is actually exercised and verified.
    gamma = jnp.array([0.75], dtype=jnp.float32)

    out = jax.block_until_ready(
        self_attention_forward(x, wq, bq, wk, bk, wv, bv, gamma))
    ref = jax.block_until_ready(
        self_attention_ref(x, wq, bq, wk, bk, wv, bv, gamma))

    # bf16 MXU operands (f32 accumulation) -> ~1e-3 level deviation vs exact f32.
    np.testing.assert_allclose(np.asarray(out), np.asarray(ref),
                               rtol=2e-2, atol=2e-2)
    print("KERNEL_OK")
</pallas_src>

<mosaic_0001>
module attributes {stable_mosaic.version = 11 : i64} {
  func.func @kernel(%arg0: i32, %arg1: memref<1x40x256xf32, #tpu.memory_space<vmem>>, %arg2: memref<40x40xbf16, #tpu.memory_space<vmem>>, %arg3: memref<40x40xbf16, #tpu.memory_space<vmem>>, %arg4: memref<1xf32, #tpu.memory_space<smem>>, %arg5: memref<1x32x256xf32, #tpu.memory_space<vmem>>) attributes {dimension_semantics = [#tpu.dimension_semantics<parallel>], iteration_bounds = array<i64: 2>, scalar_prefetch = 0 : i64, scratch_operands = 0 : i64, tpu.core_type = #tpu.core_type<tc>, window_params = [{transform_indices = @transform_0, window_bounds = array<i64: 1, 40, 256>}, {pipeline_mode = #tpu.pipeline_mode<synchronous>, transform_indices = @transform_1, window_bounds = array<i64: 40, 40>}, {pipeline_mode = #tpu.pipeline_mode<synchronous>, transform_indices = @transform_2, window_bounds = array<i64: 40, 40>}, {transform_indices = @transform_3, window_bounds = array<i64: 1>}, {transform_indices = @transform_4, window_bounds = array<i64: 1, 32, 256>}]} {
    %c0 = arith.constant 0 : index
    %c0_0 = arith.constant 0 : index
    %c0_1 = arith.constant 0 : index
    %0 = vector.load %arg1[%c0, %c0_0, %c0_1] : memref<1x40x256xf32, #tpu.memory_space<vmem>>, vector<1x40x256xf32>
    %1 = vector.shape_cast %0 : vector<1x40x256xf32> to vector<40x256xf32>
    %2 = arith.truncf %1 : vector<40x256xf32> to vector<40x256xbf16>
    %c0_2 = arith.constant 0 : index
    %c0_3 = arith.constant 0 : index
    %3 = vector.load %arg2[%c0_2, %c0_3] : memref<40x40xbf16, #tpu.memory_space<vmem>>, vector<40x40xbf16>
    %cst = arith.constant dense<0.000000e+00> : vector<40x256xf32>
    %4 = tpu.matmul %3, %2, %cst {dimension_numbers = #tpu.dot_dimension_numbers<[1], [0], [0], [1], [0, 0, 1, 1], [], []>} : vector<40x40xbf16>, vector<40x256xbf16>, vector<40x256xf32> -> vector<40x256xf32>
    %5 = arith.truncf %4 : vector<40x256xf32> to vector<40x256xbf16>
    %cst_4 = arith.constant dense<0.000000e+00> : vector<256x256xf32>
    %6 = tpu.matmul %2, %5, %cst_4 {dimension_numbers = #tpu.dot_dimension_numbers<[0], [0], [1], [1], [0, 1, 1, 1], [], []>} : vector<40x256xbf16>, vector<40x256xbf16>, vector<256x256xf32> -> vector<256x256xf32>
    %cst_5 = arith.constant dense<0xFF800000> : vector<256xf32>
    %7 = vector.multi_reduction <maximumf>, %6, %cst_5 [1] : vector<256x256xf32> to vector<256xf32>
    %8 = vector.shape_cast %7 : vector<256xf32> to vector<256x1xf32>
    %9 = vector.broadcast %8 : vector<256x1xf32> to vector<256x256xf32>
    %10 = arith.subf %6, %9 : vector<256x256xf32>
    %11 = math.exp %10 : vector<256x256xf32>
    %12 = arith.truncf %11 : vector<256x256xf32> to vector<256x256xbf16>
    %c0_6 = arith.constant 0 : index
    %c0_7 = arith.constant 0 : index
    %13 = vector.load %arg3[%c0_6, %c0_7] : memref<40x40xbf16, #tpu.memory_space<vmem>>, vector<40x40xbf16>
    %cst_8 = arith.constant dense<0.000000e+00> : vector<40x256xf32>
    %14 = tpu.matmul %13, %2, %cst_8 {dimension_numbers = #tpu.dot_dimension_numbers<[1], [0], [0], [1], [0, 0, 1, 1], [], []>} : vector<40x40xbf16>, vector<40x256xbf16>, vector<40x256xf32> -> vector<40x256xf32>
    %15 = arith.truncf %14 : vector<40x256xf32> to vector<40x256xbf16>
    %cst_9 = arith.constant dense<0.000000e+00> : vector<40x256xf32>
    %16 = tpu.matmul %15, %12, %cst_9 {dimension_numbers = #tpu.dot_dimension_numbers<[1], [1], [0], [0], [0, 0, 1, 0], [], []>} : vector<40x256xbf16>, vector<256x256xbf16>, vector<40x256xf32> -> vector<40x256xf32>
    %17 = vector.extract_strided_slice %16 {offsets = [0, 0], sizes = [32, 256], strides = [1, 1]} : vector<40x256xf32> to vector<32x256xf32>
    %18 = vector.extract_strided_slice %16 {offsets = [32, 0], sizes = [1, 256], strides = [1, 1]} : vector<40x256xf32> to vector<1x256xf32>
    %19 = tpu.reciprocal %18 {approx = true} : vector<1x256xf32> -> vector<1x256xf32>
    %20 = vector.broadcast %19 : vector<1x256xf32> to vector<32x256xf32>
    %21 = arith.mulf %17, %20 : vector<32x256xf32>
    %c0_10 = arith.constant 0 : index
    %22 = memref.load %arg4[%c0_10] : memref<1xf32, #tpu.memory_space<smem>>
    %23 = vector.broadcast %22 : f32 to vector<32x256xf32>
    %24 = arith.mulf %23, %21 : vector<32x256xf32>
    %25 = vector.extract_strided_slice %1 {offsets = [0, 0], sizes = [32, 256], strides = [1, 1]} : vector<40x256xf32> to vector<32x256xf32>
    %26 = arith.addf %24, %25 : vector<32x256xf32>
    %c0_11 = arith.constant 0 : index
    %c0_12 = arith.constant 0 : index
    %c0_13 = arith.constant 0 : index
    %27 = vector.load %arg5[%c0_11, %c0_12, %c0_13] : memref<1x32x256xf32, #tpu.memory_space<vmem>>, vector<1x32x256xf32>
    %28 = vector.shape_cast %27 : vector<1x32x256xf32> to vector<32x256xf32>
    %29 = vector.shape_cast %26 : vector<32x256xf32> to vector<1x32x256xf32>
    tpu.vector_store %arg5[%c0_11, %c0_12, %c0_13], %29 {strides = array<i32>} : memref<1x32x256xf32, #tpu.memory_space<vmem>>, vector<1x32x256xf32>,
    return
  }
  func.func @transform_0(%arg0: i32) -> (i32, i32, i32) {
    %c0_i32 = arith.constant 0 : i32
    %c0_i32_0 = arith.constant 0 : i32
    %c0_i32_1 = arith.constant 0 : i32
    return %arg0, %c0_i32, %c0_i32_0 : i32, i32, i32
  }
  func.func @transform_1(%arg0: i32) -> (i32, i32) {
    %c0_i32 = arith.constant 0 : i32
    %c0_i32_0 = arith.constant 0 : i32
    %c0_i32_1 = arith.constant 0 : i32
    return %c0_i32, %c0_i32_0 : i32, i32
  }
  func.func @transform_2(%arg0: i32) -> (i32, i32) {
    %c0_i32 = arith.constant 0 : i32
    %c0_i32_0 = arith.constant 0 : i32
    %c0_i32_1 = arith.constant 0 : i32
    return %c0_i32, %c0_i32_0 : i32, i32
  }
  func.func @transform_3(%arg0: i32) -> i32 {
    %c0_i32 = arith.constant 0 : i32
    %c0_i32_0 = arith.constant 0 : i32
    return %c0_i32 : i32
  }
  func.func @transform_4(%arg0: i32) -> (i32, i32, i32) {
    %c0_i32 = arith.constant 0 : i32
    %c0_i32_0 = arith.constant 0 : i32
    %c0_i32_1 = arith.constant 0 : i32
    return %arg0, %c0_i32, %c0_i32_0 : i32, i32, i32
  }
}

</mosaic_0001>

<bundles_post_ra>
// kernel: tpu_custom_call.1
= control target key start
LH: loop header
LB: loop body
LE: loop exit
PB: predicated region body
PF: predicated region fallthrough
CT: control target
= control target key end

     0   :  { %s2288_s0 = inlined_call_operand.hbm [shape: f32[2,40,256], index: 0, kind: input, shape index: {}]   ;;  %s2289_s1 = inlined_call_operand.hbm [shape: bf16[40,40], index: 1, kind: input, shape index: {}]   ;;  %s2290_s2 = inlined_call_operand.hbm [shape: bf16[40,40], index: 2, kind: input, shape index: {}]   ;;  %s2291_s3 = inlined_call_operand.<no memory space> [shape: f32[1], index: 3, kind: input, shape index: {}]   ;;  %s2292_s4 = inlined_call_operand.hbm [shape: f32[2,32,256], index: 4, kind: output, shape index: {}]  }
   0x1   :  { %9 = sst [smem:[#allocation2]] %s2291_s3 }
   0x2   :  { %10 = vsyncpa [#allocation4], 0 }
   0x3   :  { %12 = vsyncpa [#allocation4 + $0x1], 0 }
   0x4   :  { %13 = vsyncpa [#allocation7], 0 }
   0x5   :  { %14 = vsyncpa [#allocation5], 0 }
   0x6   :  { %16 = vsyncpa [#allocation5 + $0x1], 0  ;;  %s1728_s17 = smov 0   ;;  %s1730_s18 = smov 0  }
   0x7   :  { %s1732_s19 = smov 0   ;;  %s1734_s20 = smov 0  }
   0x8 LB: > { %s1749_s3 = sadd.s32 4294967295, %s1687_s20   ;;  %s1269_s21 = sadd.s32 4294967294, %s1687_s20   ;;  %s1687_s20 = sphi %s1734_s20, %s2358_s20   ;;  %s1683_s19 = sphi %s1732_s19, %s2357_s19   ;;  %s1679_s18 = sphi %s1730_s18, %s2356_s18   ;;  %s1675_s17 = sphi %s1728_s17, %s2355_s17  }
   0x9   : > { %p42_p0 = scmp.ne.s32.totalorder %s1679_s18, %s1675_s17  ;;  %p2293_p1 = scmp.eq.s32.totalorder %s1749_s3, 0 }
   0xa   : > { %p135_p3 = scmp.eq.s32.totalorder %s1269_s21, 1  ;;  %p1270_p5 = scmp.ge.s32.totalorder %s1687_s20, 1 }
   0xb   : > { %p1758_p4 = por %p2293_p1, %p42_p0  ;;  %p142_p7 = scmp.lt.s32.totalorder %s1687_s20, 3 }
   0xc   : > { %p1763_p6 = por %p135_p3, %p42_p0  ;;  %s1689_s25 = smov [#allocation6]  }
   0xd   : > { %s2311_s22 = scalar_select %p1758_p4, 1, 0 }
   0xe   : > { %s2312_s23 = scalar_select %p1763_p6, 1, 0 }
   0xf   : > { %p1768_p8 = pnand %p1270_p5, %p142_p7  ;;  %s154_s26 = sshll.u32 %s1689_s25, 4  ;;  %s155_s26 = int_to_ptr.vmem [resolvable:$true] %s154_s26 }
  0x10   : > { %s1690_s28 = smov [#allocation8]   ;;  %s1550_s30 = scalar_lea.vmem %s155_s26, 320 }
  0x11   : > { %s2313_s24 = scalar_select %p1768_p8, 1, 0 }
  0x12   : > { %p1331_p9 = pneg %p1768_p8  ;;  %s167_s29 = sshll.u32 %s1690_s28, 4  ;;  %s168_s29 = int_to_ptr.vmem [resolvable:$true] %s167_s29 }
  0x13   : > { %p1551_p13 = scmp.ne.s32.totalorder %s155_s26, %s1550_s30  ;;  %p1558_p5 = scmp.lt.s32.totalorder %s155_s26, %s155_s26 }
  0x14   : > { %p1777_p11 = pnand %p1331_p9, %p2293_p1  ;;  %p1559_p7 = scmp.lt.s32.totalorder %s1550_s30, %s1550_s30 }
  0x16   : > { %p1541_p12 = pneg %p1777_p11  ;;  %p1560_p10 = por %p1559_p7, %p1558_p5 }
  0x18   : > { %p1553_p0 = pnand %p1551_p13, %p1541_p12 }
  0x1a   : > { %p1554_p3 = pneg %p1553_p0 }
  0x1c   : > { %p1561_p9 = pnand %p1560_p10, %p1554_p3 }
  0x1e   : > { %1564 = shalt.err (!%p1561_p9)
}
  0x1f   : > { %s1691_s5 = smov 64   ;;  %s1692_s6 = smov 4  }
  0x20   : > { %1334 = dma.hbm_to_vmem [thread:$0]  (!%p1777_p11), %s2289_s1, 320, %s155_s26, [#allocation7], %s1691_s5, %s1691_s5, %s1692_s6  }
  0x21   : > { %s1576_s9 = scalar_lea.vmem %s168_s29, 320  ;;  %p1584_p2 = scmp.lt.s32.totalorder %s168_s29, %s168_s29 }
  0x22   : > { %p1577_p1 = scmp.ne.s32.totalorder %s168_s29, %s1576_s9  ;;  %p1585_p6 = scmp.lt.s32.totalorder %s1576_s9, %s1576_s9 }
  0x24   : > { %p1579_p13 = pnand %p1577_p1, %p1541_p12  ;;  %p1586_p5 = por %p1585_p6, %p1584_p2 }
  0x26   : > { %p1580_p0 = pneg %p1579_p13 }
  0x28   : > { %p1587_p10 = pnand %p1586_p5, %p1580_p0 }
  0x2a   : > { %1590 = shalt.err (!%p1587_p10)
}
  0x2b   : > { %1337 = dma.hbm_to_vmem [thread:$0]  (!%p1777_p11), %s2290_s2, 320, %s168_s29, [#allocation7], %s1691_s5, %s1691_s5, %s1692_s6  }
  0x2c   : > { %s1800_s12 = sadd.s32 1, %s1687_s20   ;;  %s29_s13 = sadd.s32 1, %s1683_s19 }
  0x2d   : > { %s26_s14 = ssub.s32 %s1687_s20, %s1800_s12  ;;  %p36_p1 = scmp.ne.s32.totalorder %s1683_s19, %s1679_s18 }
  0x2e   : > { %p27_p2 = scmp.eq.s32.totalorder %s26_s14, 0  ;;  %p37_p6 = scmp.eq.s32.totalorder %s1687_s20, 0 }
  0x2f   : > { %p2315_p12 = scmp.eq.s32.totalorder %s1749_s3, 1  ;;  %p1348_p7 = scmp.lt.s32.totalorder %s1687_s20, 2 }
  0x30   : > { %s1816_s16 = scalar_select %p27_p2, %s1683_s19, %s29_s13  }
  0x31   : > { %p1810_p3 = por %p2315_p12, %p36_p1  ;;  %p38_p9 = por %p37_p6, %p36_p1 }
  0x32   : > { %s184_s21 = sand.u32 1, %s1683_s19   ;;  %s1317_s26 = smul.u32 1280, %s1687_s20 }
  0x33   : > { %s2316_s15 = scalar_select %p1810_p3, 1, 0 }
  0x34   : > { %s1316_s25 = smul.u32 80, %s184_s21  ;;  %p1820_p11 = pnand %p1348_p7, %p38_p9 }
  0x35   : > { %s1827_s30 = scalar_lea.hbm %s2288_s0, %s1317_s26  ;;  %s1831_s7 = scalar_lea.sflag [#allocation4], %s184_s21 }
  0x36   : > { %s188_s5 = scalar_lea.vmem [#allocation3], %s1316_s25  ;;  %s1591_s8 = scalar_lea.hbm %s1827_s30, 1280 }
  0x37   : > { %s195_s6 = sshll.u32 %s188_s5, 4  ;;  %p1592_p13 = scmp.ne.s32.totalorder %s1827_s30, %s1591_s8  ;;  %s1829_s6 = int_to_ptr.vmem [resolvable:$true] %s195_s6 }
  0x38   : > { %p1593_p0 = pneg %p1820_p11  ;;  %s1596_s11 = scalar_lea.hbm %s2288_s0, 2560 }
  0x39   : > { %p1597_p1 = scmp.lt.s32.totalorder %s1827_s30, %s2288_s0  ;;  %p1598_p2 = scmp.lt.s32.totalorder %s1596_s11, %s1591_s8 }
  0x3a   : > { %p1594_p5 = pnand %p1593_p0, %p1592_p13 }
  0x3b   : > { %p1599_p6 = por %p1598_p2, %p1597_p1 }
  0x3c   : > { %p1595_p10 = pneg %p1594_p5 }
  0x3e   : > { %p1600_p12 = pnand %p1599_p6, %p1595_p10 }
  0x40   : > { %1603 = shalt.err (!%p1600_p12)
}
  0x41   : > { %s1604_s21 = scalar_lea.vmem %s1829_s6, 1280  ;;  %s1693_s25 = smov [#allocation3]  }
  0x42   : > { %p1605_p7 = scmp.ne.s32.totalorder %s1829_s6, %s1604_s21  ;;  %s1609_s26 = sshll.u32 %s1693_s25, 4  ;;  %s1610_s26 = int_to_ptr.vmem [resolvable:$false] %s1609_s26 }
  0x43   : > { %s1611_s28 = scalar_lea.vmem %s1610_s26, 2560  ;;  %p1612_p5 = scmp.lt.s32.totalorder %s1829_s6, %s1610_s26 }
  0x44   : > { %p1607_p9 = pnand %p1605_p7, %p1593_p0  ;;  %p1613_p3 = scmp.lt.s32.totalorder %s1611_s28, %s1604_s21 }
  0x46   : > { %p1608_p13 = pneg %p1607_p9  ;;  %p1614_p4 = por %p1613_p3, %p1612_p5 }
  0x48   : > { %p1615_p8 = pnand %p1614_p4, %p1608_p13 }
  0x4a   : > { %1618 = shalt.err (!%p1615_p8)
}
  0x4b   : > { %s1694_s29 = smov 256   ;;  %s1695_s5 = smov 16  }
  0x4c   : > { %1341 = dma.hbm_to_vmem [thread:$0]  (!%p1820_p11), %s1827_s30, 1280, %s1829_s6, %s1831_s7, %s1694_s29, %s1694_s29, %s1695_s5  }
  0x4d   : > { %p2318_p0 = scmp.ne.s32.totalorder %s2313_s24, 0 }
  0x4f   : > { %207 = sbr.rel (%p2318_p0) target bundleno = 1125 (0x465), region = 36 }
  0x54   : > { %s1855_s8 = sand.u32 1, %s1679_s18   ;;  %p2319_p4 = scmp.ne.s32.totalorder %s2311_s22, 0 }
  0x55   : > { %s1318_s9 = smul.u32 80, %s1855_s8  ;;  %s210_s10 = scalar_lea.sflag [#allocation4], %s1855_s8 }
  0x57   : > { %s1859_s11 = scalar_lea.vmem [#allocation3], %s1318_s9 }
  0x58   : > { %1662 = dma.done.wait (%p2319_p4), %s210_s10, 1280  }
  0x59   : > { %1664 = vsyncadd (%p2319_p4), %s210_s10, 4294966016  ;;  %p2320_p8 = scmp.eq.s32.totalorder %s1749_s3, 0 }
  0x5b   : > { %1666 = dma.done.wait (%p2320_p8), [#allocation7], 640   ;;  %p2321_p3 = pmov %p2320_p8 }
  0x5c   : > { %v1696_v0 = vmov 0   ;;  %v256_v1 = vld [vmem:[%s1859_s11 + $0x48] sm:$0xff]  ;;  %vm291_vm0 = vcmask 1043456   ;;  %v255_v2 = vld [vmem:[%s1859_s11 + $0x40] sm:$0xff]  ;;  %v254_v6 = vld [vmem:[%s1859_s11 + $0x38] sm:$0xff]  ;;  %vm281_vm1 = vcmask 326656  }
  0x5d   : > { %1668 = vsyncadd (%p2321_p3), [#allocation7], 4294966656  ;;  %330 = vmatprep.mubr.bf16.mxu0 %v1696_v0  ;;  %483 = vmatprep.mubr.bf16.mxu1 %v1696_v0  ;;  %v252_v3 = vld [vmem:[%s1859_s11 + $0x28] sm:$0xff]  ;;  %v262_v4 = vpack.c.bf16 %v256_v1, %v256_v1  ;;  %v261_v5 = vpack.c.bf16 %v255_v2, %v255_v2  ;;  %v251_v7 = vld [vmem:[%s1859_s11 + $0x20] sm:$0xff]  ;;  %s1137_s22 = sld [smem:[#allocation2]]  ;;  %s1278_s24 = sshll.u32 %s1855_s8, 6 }
  0x5e   : > { %v253_v8 = vld [vmem:[%s1859_s11 + $0x30] sm:$0xff]  ;;  %v260_v9 = vpack.c.bf16 %v254_v6, %v252_v3  ;;  %v248_v10 = vld [vmem:[%s1859_s11 + $0x8] sm:$0xff]  ;;  %v250_v11 = vld [vmem:[%s1859_s11 + $0x18] sm:$0xff]  ;;  %s1315_s27 = sshll.u32 %s1749_s3, 10  ;;  %s2221_s30 = scalar_lea.vmem [#allocation9], %s1278_s24 }
  0x5f   : > { %v247_v12 = vld [vmem:[%s1859_s11] sm:$0xff]  ;;  %1282 = vmatprep.subr.msk.bf16.mxu0 %vm291_vm0, %v262_v4  ;;  %v293_v13 = vsel %vm291_vm0, %v261_v5, 0  ;;  %v258_v14 = vpack.c.bf16 %v250_v11, %v248_v10  ;;  %v249_v15 = vld [vmem:[%s1859_s11 + $0x10] sm:$0xff]  ;;  %v259_v16 = vpack.c.bf16 %v253_v8, %v251_v7  ;;  %v1394_v19 = vld [vmem:[#allocation6 + $0x8] sm:$0xff]   ;;  %s1177_s6 = sshll.u32 %s2221_s30, 4  ;;  %s2235_s13 = scalar_lea.hbm %s2292_s4, %s1315_s27  ;;  %s2237_s6 = int_to_ptr.vmem [resolvable:$true] %s1177_s6 }
  0x60   : > { %309 = vmatpush1.bf16.msra.mxu0 %v293_v13  ;;  %v257_v17 = vpack.c.bf16 %v249_v15, %v247_v12  ;;  %v1393_v18 = vld [vmem:[#allocation6] sm:$0xff]   ;;  %v1395_v20 = vld [vmem:[#allocation6 + $0x10] ss:$0 sps:$4 sm:$0xff]   ;;  %v1396_v63 = vld [vmem:[#allocation8] sm:$0xff]   ;;  %s1164_s14 = scalar_lea.sflag [#allocation5], %s1855_s8  ;;  %s1619_s21 = scalar_lea.vmem %s2237_s6, 1024 }
  0x61   : > { %310 = vmatprep.subr.bf16.mxu0 %v260_v9  ;;  %381 = vxpose.xlu1.c.b16.start [1/3] (short) %v258_v14, 128  ;;  %v1398_v10 = vld [vmem:[#allocation8 + $0x10] ss:$0 sps:$4 sm:$0xff]   ;;  %p1620_p11 = scmp.ne.s32.totalorder %s2237_s6, %s1619_s21  ;;  %p2352_p10 = scmp.ne.s32.totalorder %s2316_s15, 0 }
  0x62   : > { %365 = vxpose.xlu0.c.b16.start [1/3] (short) %v257_v17, 128  ;;  %s1697_s25 = smov [#allocation9]  }
  0x63   : > { %p1621_p1 = pnand %p1620_p11, %p2352_p10  ;;  %s1623_s26 = sshll.u32 %s1697_s25, 4  ;;  %s1624_s26 = int_to_ptr.vmem [resolvable:$false] %s1623_s26 }
  0x64   : > { %311 = vmatpush1.bf16.msra.mxu0 %v259_v16  ;;  %s1625_s28 = scalar_lea.vmem %s1624_s26, 2048  ;;  %p1626_p6 = scmp.lt.s32.totalorder %s2237_s6, %s1624_s26 }
  0x65   : > { %312 = vmatprep.subr.bf16.mxu0 %v258_v14  ;;  %382 = vxpose.xlu1.c.b16.cont [2/3] (short) %v260_v9, 128  ;;  %p1622_p2 = pneg %p1621_p1  ;;  %p1627_p12 = scmp.lt.s32.totalorder %s1625_s28, %s1619_s21 }
  0x66   : > { %366 = vxpose.xlu0.c.b16.cont [2/3] (short) %v259_v16, 128 }
  0x67   : > { %p1628_p7 = por %p1627_p12, %p1626_p6 }
  0x68   : > { %313 = vmatpush1.bf16.msra.mxu0 %v257_v17 }
  0x69   : > { %383 = vxpose.xlu1.c.b16.end [3/3] (short) %v262_v4, 128  ;;  %1306 = vmatprep.subr.msk.bf16.mxu0 %vm291_vm0, %v262_v4  ;;  %p1629_p9 = pnand %p1628_p7, %p1622_p2 }
  0x6a   : > { %367 = vxpose.xlu0.c.b16.end [3/3] (short) %v261_v5, 128  ;;  %v1397_v5 = vld [vmem:[#allocation8 + $0x8] sm:$0xff]  }
  0x6b   : > { %1283 = vmatmul.mubr.msk.bf16.vlgmr.msra.gmra.mxu0 %vm281_vm1, %v1393_v18 }
  0x6c   : > { %340 = vmatprep.mubr.bf16.mxu0 %v1696_v0  ;;  %1002 = vmatpush1.bf16.msra.mxu0 %v293_v13 }
  0x6d   : > { %1003 = vmatprep.subr.bf16.mxu0 %v260_v9 }
  0x70   : > { %1004 = vmatpush1.bf16.msra.mxu0 %v259_v16 }
  0x71   : > { %1005 = vmatprep.subr.bf16.mxu0 %v258_v14 }
  0x73   : > { %1284 = vmatmul.mubr.msk.bf16.gmra.mxu0 %vm281_vm1, %v1394_v19 }
  0x74   : > { %350 = vmatprep.mubr.bf16.mxu0 %v1696_v0  ;;  %1006 = vmatpush1.bf16.msra.mxu0 %v257_v17 }
  0x7b   : > { %1285 = vmatmul.mubr.msk.bf16.gmra.mxu0 %vm281_vm1, %v1395_v20 }
  0x7c   : > { %1023 = vmatprep.mubr.bf16.mxu0 %v1696_v0 }
  0x83   : > { %1307 = vmatmul.mubr.msk.bf16.vlgmr.msra.gmra.mxu0 %vm281_vm1, %v1396_v63 }
  0x84   : > { %1033 = vmatprep.mubr.bf16.mxu0 %v1696_v0 }
  0x8b   : > { %1308 = vmatmul.mubr.msk.bf16.gmra.mxu0 %vm281_vm1, %v1397_v5 }
  0x8c   : > { %1043 = vmatprep.mubr.bf16.mxu0 %v1696_v0 }
  0x93   : > { %1309 = vmatmul.mubr.msk.bf16.gmra.mxu0 %vm281_vm1, %v1398_v10 }
  0xc3   : > { %v389_v48 = vpop.trf.xlu1 }
  0xc4   : > { %v373_v40 = vpop.trf.xlu0 }
  0xc7   : > { %v390_v49 = vpop.trf.xlu1 }
  0xc8   : > { %v374_v41 = vpop.trf.xlu0 }
  0xcb   : > { %v391_v50 = vpop.trf.xlu1 }
  0xcc   : > { %v375_v42 = vpop.trf.xlu0 }
  0xcf   : > { %v392_v51 = vpop.trf.xlu1 }
  0xd0   : > { %v376_v43 = vpop.trf.xlu0 }
  0xd3   : > { %v393_v52 = vpop.trf.xlu1 }
  0xd4   : > { %v377_v44 = vpop.trf.xlu0 }
  0xd7   : > { %v394_v53 = vpop.trf.xlu1 }
  0xd8   : > { %v378_v45 = vpop.trf.xlu0 }
  0xdb   : > { %v395_v54 = vpop.trf.xlu1 }
  0xdc   : > { %v379_v46 = vpop.trf.xlu0 }
  0xdf   : > { %v396_v55 = vpop.trf.xlu1 }
  0xe0   : > { %v380_v47 = vpop.trf.xlu0 }
 0x12b   : > { %v332_v21 = vpop.f32.mrf.mxu0 }
 0x12d   : > { %v334_v22 = vpop.f32.mrf.mxu0 }
 0x12f   : > { %v336_v23 = vpop.f32.mrf.mxu0 }
 0x130   : > { %v359_v39 = vpack.c.bf16 %v336_v23, %v332_v21 }
 0x131   : > { %v338_v24 = vpop.f32.mrf.mxu0 }
 0x132   : > { %v360_v38 = vpack.c.bf16 %v338_v24, %v334_v22 }
 0x133   : > { %v342_v25 = vpop.f32.mrf.mxu0 }
 0x135   : > { %v344_v26 = vpop.f32.mrf.mxu0 }
 0x137   : > { %v346_v27 = vpop.f32.mrf.mxu0 }
 0x138   : > { %v361_v37 = vpack.c.bf16 %v346_v27, %v342_v25 }
 0x139   : > { %v348_v28 = vpop.f32.mrf.mxu0 }
 0x13a   : > { %v362_v34 = vpack.c.bf16 %v348_v28, %v344_v26 }
 0x13b   : > { %v352_v29 = vpop.f32.mrf.mxu0 }
 0x13c   : > { %v363_v30 = vpack.c.bf16 %v352_v29, %v352_v29 }
 0x13d   : > { %v354_v31 = vpop.f32.mrf.mxu0 }
 0x13e   : > { %v364_v32 = vpack.c.bf16 %v354_v31, %v354_v31  ;;  %v446_v35 = vsel %vm291_vm0, %v363_v30, 0 }
 0x13f   : > { %v356_v33 = vpop.f32.mrf.mxu0 }
 0x140   : > { %1286 = vmatprep.subr.msk.bf16.mxu1 %vm291_vm0, %v364_v32 }
 0x141   : > { %v357_v36 = vpop.f32.mrf.mxu0  ;;  %462 = vmatpush1.bf16.msra.mxu1 %v446_v35 }
 0x142   : > { %463 = vmatprep.subr.bf16.mxu1 %v362_v34 }
 0x145   : > { %464 = vmatpush1.bf16.msra.mxu1 %v361_v37 }
 0x146   : > { %465 = vmatprep.subr.bf16.mxu1 %v360_v38 }
 0x149   : > { %466 = vmatpush1.bf16.msra.mxu1 %v359_v39 }
 0x14c   : > { %1287 = vmatmul.mubr.msk.bf16.vlgmr.msra.gmra.mxu1 %vm281_vm1, %v373_v40 }
 0x14d   : > { %493 = vmatprep.mubr.bf16.mxu1 %v1696_v0 }
 0x154   : > { %1288 = vmatmul.mubr.msk.bf16.gmra.mxu1 %vm281_vm1, %v374_v41 }
 0x155   : > { %503 = vmatprep.mubr.bf16.mxu1 %v1696_v0 }
 0x15c   : > { %1289 = vmatmul.mubr.msk.bf16.gmra.mxu1 %vm281_vm1, %v375_v42 }
 0x15d   : > { %513 = vmatprep.mubr.bf16.mxu1 %v1696_v0 }
 0x164   : > { %1290 = vmatmul.mubr.msk.bf16.gmra.mxu1 %vm281_vm1, %v376_v43 }
 0x165   : > { %523 = vmatprep.mubr.bf16.mxu1 %v1696_v0 }
 0x16c   : > { %1291 = vmatmul.mubr.msk.bf16.gmra.mxu1 %vm281_vm1, %v377_v44 }
 0x16d   : > { %533 = vmatprep.mubr.bf16.mxu1 %v1696_v0 }
 0x174   : > { %1292 = vmatmul.mubr.msk.bf16.gmra.mxu1 %vm281_vm1, %v378_v45 }
 0x175   : > { %543 = vmatprep.mubr.bf16.mxu1 %v1696_v0 }
 0x17c   : > { %1293 = vmatmul.mubr.msk.bf16.gmra.mxu1 %vm281_vm1, %v379_v46 }
 0x17d   : > { %553 = vmatprep.mubr.bf16.mxu1 %v1696_v0 }
 0x184   : > { %1294 = vmatmul.mubr.msk.bf16.gmra.mxu1 %vm281_vm1, %v380_v47 }
 0x185   : > { %563 = vmatprep.mubr.bf16.mxu1 %v1696_v0 }
 0x18c   : > { %1295 = vmatmul.mubr.msk.bf16.gmra.mxu1 %vm281_vm1, %v389_v48 }
 0x18d   : > { %573 = vmatprep.mubr.bf16.mxu1 %v1696_v0 }
 0x194   : > { %1296 = vmatmul.mubr.msk.bf16.gmra.mxu1 %vm281_vm1, %v390_v49 }
 0x195   : > { %583 = vmatprep.mubr.bf16.mxu1 %v1696_v0 }
 0x19c   : > { %1297 = vmatmul.mubr.msk.bf16.gmra.mxu1 %vm281_vm1, %v391_v50 }
 0x19d   : > { %593 = vmatprep.mubr.bf16.mxu1 %v1696_v0 }
 0x1a4   : > { %1298 = vmatmul.mubr.msk.bf16.gmra.mxu1 %vm281_vm1, %v392_v51 }
 0x1a5   : > { %603 = vmatprep.mubr.bf16.mxu1 %v1696_v0 }
 0x1ac   : > { %1299 = vmatmul.mubr.msk.bf16.gmra.mxu1 %vm281_vm1, %v393_v52 }
 0x1ad   : > { %613 = vmatprep.mubr.bf16.mxu1 %v1696_v0 }
 0x1b4   : > { %1300 = vmatmul.mubr.msk.bf16.gmra.mxu1 %vm281_vm1, %v394_v53 }
 0x1b5   : > { %623 = vmatprep.mubr.bf16.mxu1 %v1696_v0 }
 0x1bc   : > { %1301 = vmatmul.mubr.msk.bf16.gmra.mxu1 %vm281_vm1, %v395_v54 }
 0x1bd   : > { %633 = vmatprep.mubr.bf16.mxu1 %v1696_v0 }
 0x1c4   : > { %1302 = vmatmul.mubr.msk.bf16.gmra.mxu1 %vm281_vm1, %v396_v55 }
 0x20c   : > { %v1923_v56 = vpop.f32.mrf.mxu1 }
 0x20d   : > { %2322 = vst [vmem:[#allocation13_spill] sm:$0xff] %v1923_v56 }
 0x20e   : > { %v1925_v57 = vpop.f32.mrf.mxu1 }
 0x20f   : > { %2323 = vst [vmem:[#allocation14_spill] sm:$0xff] %v1925_v57  ;;  %v644_v52 = vmax.f32 %v1923_v56, %v1925_v57 }
 0x210   : > { %v1927_v58 = vpop.f32.mrf.mxu1 }
 0x211   : > { %2324 = vst [vmem:[#allocation15_spill] sm:$0xff] %v1927_v58 }
 0x212   : > { %v1929_v59 = vpop.f32.mrf.mxu1 }
 0x213   : > { %2325 = vst [vmem:[#allocation16_spill] sm:$0xff] %v1929_v59  ;;  %v647_v63 = vmax.f32 %v1927_v58, %v1929_v59 }
 0x214   : > { %v1931_v60 = vpop.f32.mrf.mxu1 }
 0x215   : > { %2326 = vst [vmem:[#allocation17_spill] sm:$0xff] %v1931_v60 }
 0x216   : > { %v1933_v61 = vpop.f32.mrf.mxu1 }
 0x217   : > { %v650_v48 = vmax.f32 %v1931_v60, %v1933_v61 }
 0x218   : > { %v1935_v62 = vpop.f32.mrf.mxu1 }
 0x21a   : > { %v1937_v1 = vpop.f32.mrf.mxu1 }
 0x21b   : > { %v653_v53 = vmax.f32 %v1935_v62, %v1937_v1 }
 0x21c   : > { %v1940_v2 = vpop.f32.mrf.mxu1 }
 0x21e   : > { %v1943_v3 = vpop.f32.mrf.mxu1 }
 0x21f   : > { %v656_v44 = vmax.f32 %v1940_v2, %v1943_v3 }
 0x220   : > { %v1945_v4 = vpop.f32.mrf.mxu1 }
 0x222   : > { %v1947_v6 = vpop.f32.mrf.mxu1 }
 0x223   : > { %v659_v49 = vmax.f32 %v1945_v4, %v1947_v6 }
 0x224   : > { %v1950_v7 = vpop.f32.mrf.mxu1 }
 0x226   : > { %v1953_v8 = vpop.f32.mrf.mxu1 }
 0x227   : > { %v662_v40 = vmax.f32 %v1950_v7, %v1953_v8 }
 0x228   : > { %v1955_v9 = vpop.f32.mrf.mxu1 }
 0x22a   : > { %v1957_v11 = vpop.f32.mrf.mxu1 }
 0x22b   : > { %v665_v45 = vmax.f32 %v1955_v9, %v1957_v11 }
 0x22c   : > { %v1960_v12 = vpop.f32.mrf.mxu1 }
 0x22e   : > { %v1962_v13 = vpop.f32.mrf.mxu1 }
 0x22f   : > { %v668_v36 = vmax.f32 %v1960_v12, %v1962_v13 }
 0x230   : > { %v1964_v14 = vpop.f32.mrf.mxu1 }
 0x232   : > { %v1966_v15 = vpop.f32.mrf.mxu1 }
 0x233   : > { %v671_v41 = vmax.f32 %v1964_v14, %v1966_v15 }
 0x234   : > { %v1968_v16 = vpop.f32.mrf.mxu1 }
 0x236   : > { %v1970_v0 = vpop.f32.mrf.mxu1 }
 0x237   : > { %v674_v32 = vmax.f32 %v1968_v16, %v1970_v0 }
 0x238   : > { %v1972_v17 = vpop.f32.mrf.mxu1 }
 0x23a   : > { %v1974_v18 = vpop.f32.mrf.mxu1 }
 0x23b   : > { %v677_v37 = vmax.f32 %v1972_v17, %v1974_v18 }
 0x23c   : > { %v1976_v19 = vpop.f32.mrf.mxu1 }
 0x23e   : > { %v1978_v20 = vpop.f32.mrf.mxu1 }
 0x23f   : > { %v680_v28 = vmax.f32 %v1976_v19, %v1978_v20 }
 0x240   : > { %v1980_v21 = vpop.f32.mrf.mxu1 }
 0x242   : > { %v1982_v22 = vpop.f32.mrf.mxu1 }
 0x243   : > { %v683_v33 = vmax.f32 %v1980_v21, %v1982_v22 }
 0x244   : > { %v1984_v23 = vpop.f32.mrf.mxu1 }
 0x246   : > { %v1986_v24 = vpop.f32.mrf.mxu1 }
 0x247   : > { %v686_v25 = vmax.f32 %v1984_v23, %v1986_v24 }
 0x248   : > { %v1990_v26 = vpop.f32.mrf.mxu1 }
 0x249   : > { %687 = vmax.xlane.f32.xlu0 %v686_v25 }
 0x24a   : > { %v1992_v27 = vpop.f32.mrf.mxu1 }
 0x24b   : > { %v689_v29 = vmax.f32 %v1990_v26, %v1992_v27 }
 0x24c   : > { %v1998_v30 = vpop.f32.mrf.mxu1 }
 0x24d   : > { %2327 = vst [vmem:[#allocation18_spill] sm:$0xff] %v1998_v30  ;;  %681 = vmax.xlane.f32.xlu0 %v680_v28  ;;  %690 = vmax.xlane.f32.xlu1 %v689_v29 }
 0x24e   : > { %v2000_v31 = vpop.f32.mrf.mxu1 }
 0x24f   : > { %2328 = vst [vmem:[#allocation19_spill] sm:$0xff] %v2000_v31 }
 0x250   : > { %v2006_v34 = vpop.f32.mrf.mxu1 }
 0x251   : > { %675 = vmax.xlane.f32.xlu0 %v674_v32  ;;  %684 = vmax.xlane.f32.xlu1 %v683_v33 }
 0x252   : > { %v2008_v35 = vpop.f32.mrf.mxu1 }
 0x254   : > { %v2014_v38 = vpop.f32.mrf.mxu1 }
 0x255   : > { %2329 = vst [vmem:[#allocation20_spill] sm:$0xff] %v2014_v38  ;;  %669 = vmax.xlane.f32.xlu0 %v668_v36  ;;  %678 = vmax.xlane.f32.xlu1 %v677_v37 }
 0x256   : > { %v2016_v39 = vpop.f32.mrf.mxu1 }
 0x257   : > { %2330 = vst [vmem:[#allocation21_spill] sm:$0xff] %v2016_v39 }
 0x258   : > { %v2022_v42 = vpop.f32.mrf.mxu1 }
 0x259   : > { %2331 = vst [vmem:[#allocation22_spill] sm:$0xff] %v2022_v42  ;;  %663 = vmax.xlane.f32.xlu0 %v662_v40  ;;  %672 = vmax.xlane.f32.xlu1 %v671_v41 }
 0x25a   : > { %v2024_v43 = vpop.f32.mrf.mxu1 }
 0x25b   : > { %2332 = vst [vmem:[#allocation23_spill] sm:$0xff] %v2024_v43 }
 0x25c   : > { %v2030_v46 = vpop.f32.mrf.mxu1 }
 0x25d   : > { %2333 = vst [vmem:[#allocation24_spill] sm:$0xff] %v2030_v46  ;;  %657 = vmax.xlane.f32.xlu0 %v656_v44  ;;  %666 = vmax.xlane.f32.xlu1 %v665_v45 }
 0x25e   : > { %v2032_v47 = vpop.f32.mrf.mxu1 }
 0x260   : > { %v2038_v50 = vpop.f32.mrf.mxu1 }
 0x261   : > { %2334 = vst [vmem:[#allocation25_spill] sm:$0xff] %v2038_v50  ;;  %651 = vmax.xlane.f32.xlu0 %v650_v48  ;;  %660 = vmax.xlane.f32.xlu1 %v659_v49 }
 0x262   : > { %v2040_v51 = vpop.f32.mrf.mxu1 }
 0x264   : > { %v2046_v54 = vpop.f32.mrf.mxu1 }
 0x265   : > { %645 = vmax.xlane.f32.xlu0 %v644_v52  ;;  %654 = vmax.xlane.f32.xlu1 %v653_v53 }
 0x266   : > { %v2048_v55 = vpop.f32.mrf.mxu1 }
 0x268   : > { %v2052_v5 = vpop.f32.mrf.mxu1 }
 0x269   : > { %648 = vmax.xlane.f32.xlu1 %v647_v63 }
 0x26a   : > { %v2054_v10 = vpop.f32.mrf.mxu1 }
 0x26c   : > { %v2056_v25 = vpop.f32.mrf.mxu1 }
 0x26e   : > { %v2058_v28 = vpop.f32.mrf.mxu1 }
 0x270   : > { %v2060_v29 = vpop.f32.mrf.mxu1 }
 0x272   : > { %v2062_v32 = vpop.f32.mrf.mxu1 }
 0x274   : > { %v2064_v33 = vpop.f32.mrf.mxu1 }
 0x276   : > { %v2066_v36 = vpop.f32.mrf.mxu1 }
 0x277   : > { %v722_v60 = vmax.f32 %v2064_v33, %v2066_v36 }
 0x278   : > { %v2068_v37 = vpop.f32.mrf.mxu1 }
 0x27a   : > { %v2070_v40 = vpop.f32.mrf.mxu1 }
 0x27c   : > { %v2072_v41 = vpop.f32.mrf.mxu1 }
 0x27e   : > { %v2074_v44 = vpop.f32.mrf.mxu1 }
 0x27f   : > { %v728_v58 = vmax.f32 %v2072_v41, %v2074_v44 }
 0x280   : > { %v2076_v45 = vpop.f32.mrf.mxu1 }
 0x282   : > { %v2078_v48 = vpop.f32.mrf.mxu1 }
 0x283   : > { %v731_v59 = vmax.f32 %v2076_v45, %v2078_v48 }
 0x284   : > { %v2080_v49 = vpop.f32.mrf.mxu1 }
 0x286   : > { %v2082_v52 = vpop.f32.mrf.mxu1 }
 0x287   : > { %2335 = vst [vmem:[#allocation26_spill] sm:$0xff] %v2082_v52  ;;  %v734_v53 = vmax.f32 %v2080_v49, %v2082_v52  ;;  %v725_v52 = vmax.f32 %v2068_v37, %v2070_v40 }
 0x288   : > { %v2086_v63 = vpop.f32.mrf.mxu1 }
 0x289   : > { %735 = vmax.xlane.f32.xlu0 %v734_v53  ;;  %v716_v53 = vmax.f32 %v2056_v25, %v2058_v28 }
 0x28a   : > { %v2088_v56 = vpop.f32.mrf.mxu1 }
 0x28b   : > { %v737_v57 = vmax.f32 %v2086_v63, %v2088_v56 }
 0x28d   : > { %729 = vmax.xlane.f32.xlu0 %v728_v58  ;;  %738 = vmax.xlane.f32.xlu1 %v737_v57  ;;  %v710_v58 = vmax.f32 %v2046_v54, %v2048_v55  ;;  %v719_v57 = vmax.f32 %v2060_v29, %v2062_v32 }
 0x291   : > { %723 = vmax.xlane.f32.xlu0 %v722_v60  ;;  %732 = vmax.xlane.f32.xlu1 %v731_v59  ;;  %v704_v60 = vmax.f32 %v2030_v46, %v2032_v47  ;;  %v713_v59 = vmax.f32 %v2052_v5, %v2054_v10 }
 0x295   : > { %717 = vmax.xlane.f32.xlu0 %v716_v53  ;;  %726 = vmax.xlane.f32.xlu1 %v725_v52  ;;  %v698_v53 = vmax.f32 %v2014_v38, %v2016_v39  ;;  %v707_v52 = vmax.f32 %v2038_v50, %v2040_v51 }
 0x299   : > { %711 = vmax.xlane.f32.xlu0 %v710_v58  ;;  %720 = vmax.xlane.f32.xlu1 %v719_v57  ;;  %v692_v58 = vmax.f32 %v1998_v30, %v2000_v31  ;;  %v701_v57 = vmax.f32 %v2022_v42, %v2024_v43 }
 0x29d   : > { %705 = vmax.xlane.f32.xlu0 %v704_v60  ;;  %714 = vmax.xlane.f32.xlu1 %v713_v59  ;;  %v695_v60 = vmax.f32 %v2006_v34, %v2008_v35 }
 0x2a1   : > { %699 = vmax.xlane.f32.xlu0 %v698_v53  ;;  %708 = vmax.xlane.f32.xlu1 %v707_v52 }
 0x2a5   : > { %693 = vmax.xlane.f32.xlu0 %v692_v58  ;;  %702 = vmax.xlane.f32.xlu1 %v701_v57 }
 0x2a9   : > { %696 = vmax.xlane.f32.xlu1 %v695_v60 }
 0x2d2   : > { %v688_v59 = vpop.xlane.xlu0 %687 }
 0x2d3   : > { %v768_v38 = vsub.f32 %v1984_v23, %v688_v59  ;;  %v769_v39 = vsub.f32 %v1986_v24, %v688_v59  ;;  %v2126_v23 = vpop.f32.mrf.mxu0 }
 0x2d5   : > { %v860_v52 = vmul.f32 1.442695, %v768_v38  ;;  %v862_v30 = vmul.f32 1.442695, %v769_v39 }
 0x2d6   : > { %v682_v46 = vpop.xlane.xlu0 %681  ;;  %v691_v53 = vpop.xlane.xlu1 %690 }
 0x2d7   : > { %v770_v50 = vsub.f32 %v1990_v26, %v691_v53  ;;  %v771_v31 = vsub.f32 %v1992_v27, %v691_v53  ;;  %v765_v58 = vsub.f32 %v1978_v20, %v682_v46  ;;  %1399 = vpow2.f32 %v860_v52 }
 0x2d8   : > { %1401 = vpow2.f32 %v862_v30  ;;  %v764_v27 = vsub.f32 %v1976_v19, %v682_v46 }
 0x2d9   : > { %v864_v57 = vmul.f32 1.442695, %v770_v50  ;;  %v866_v42 = vmul.f32 1.442695, %v771_v31  ;;  %v854_v24 = vmul.f32 1.442695, %v765_v58  ;;  %v1027_v50 = vpop.f32.mrf.mxu0 }
 0x2da   : > { %v685_v43 = vpop.xlane.xlu1 %684  ;;  %v676_v59 = vpop.xlane.xlu0 %675  ;;  %v852_v53 = vmul.f32 1.442695, %v764_v27 }
 0x2db   : > { %v767_v60 = vsub.f32 %v1982_v22, %v685_v43  ;;  %1403 = vpow2.f32 %v864_v57  ;;  %v766_v38 = vsub.f32 %v1980_v21, %v685_v43  ;;  %v761_v20 = vsub.f32 %v1970_v0, %v676_v59  ;;  %v2132_v58 = vpop.f32.mrf.mxu0 }
 0x2dc   : > { %1405 = vpow2.f32 %v866_v42  ;;  %v1052_v21 = vpack.c.bf16 %v2132_v58, %v2126_v23  ;;  %v760_v46 = vsub.f32 %v1968_v16, %v676_v59 }
 0x2dd   : > { %v858_v26 = vmul.f32 1.442695, %v767_v60  ;;  %1407 = vpow2.f32 %v854_v24  ;;  %v856_v30 = vmul.f32 1.442695, %v766_v38  ;;  %v846_v57 = vmul.f32 1.442695, %v761_v20  ;;  %v1031_v0 = vpop.f32.mrf.mxu0 }
 0x2de   : > { %v679_v39 = vpop.xlane.xlu1 %678  ;;  %v670_v42 = vpop.xlane.xlu0 %669  ;;  %v1053_v43 = vpack.c.bf16 %v1031_v0, %v1027_v50 }
 0x2df   : > { %v763_v31 = vsub.f32 %v1974_v18, %v679_v39  ;;  %1409 = vpow2.f32 %v858_v26  ;;  %v762_v19 = vsub.f32 %v1972_v17, %v679_v39  ;;  %v2139_v60 = vpop.f32.mrf.mxu0  ;;  %v757_v38 = vsub.f32 %v1962_v13, %v670_v42 }
 0x2e0   : > { %1411 = vpow2.f32 %v856_v30  ;;  %1090 = vmatprep.mubr.bf16.mxu1 %v1053_v43  ;;  %v844_v30 = vmul.f32 1.442695, %v760_v46 }
 0x2e1   : > { %v850_v22 = vmul.f32 1.442695, %v763_v31  ;;  %v848_v27 = vmul.f32 1.442695, %v762_v19  ;;  %v2142_v20 = vpop.f32.mrf.mxu0 }
 0x2e2   : > { %v673_v52 = vpop.xlane.xlu1 %672 }
 0x2e3   : > { %1413 = vpow2.f32 %v850_v22  ;;  %v759_v18 = vsub.f32 %v1966_v15, %v673_v52  ;;  %v2144_v50 = vpop.f32.mrf.mxu0  ;;  %v838_v22 = vmul.f32 1.442695, %v757_v38 }
 0x2e4   : > { %1415 = vpow2.f32 %v852_v53  ;;  %v1400_v24 = vpop.eup %1399  ;;  %v664_v53 = vpop.xlane.xlu0 %663 }
 0x2e5   : > { %1417 = vpow2.f32 %v846_v57  ;;  %v1402_v26 = vpop.eup %1401  ;;  %v842_v39 = vmul.f32 1.442695, %v759_v18  ;;  %v758_v57 = vsub.f32 %v1964_v14, %v673_v52  ;;  %v2147_v13 = vpop.f32.mrf.mxu0  ;;  %v753_v14 = vsub.f32 %v1953_v8, %v664_v53 }
 0x2e6   : > { %v667_v15 = vpop.xlane.xlu1 %666  ;;  %1419 = vpow2.f32 %v848_v27 }
 0x2e7   : > { %1421 = vpow2.f32 %v842_v39  ;;  %v755_v19 = vsub.f32 %v1957_v11, %v667_v15  ;;  %v2155_v38 = vpop.f32.mrf.mxu0  ;;  %v830_v43 = vmul.f32 1.442695, %v753_v14 }
 0x2e8   : > { %v1404_v17 = vpop.eup %1403  ;;  %1423 = vpow2.f32 %v844_v30 }
 0x2e9   : > { %v1406_v31 = vpop.eup %1405  ;;  %v946_v59 = vpack.c.bf16 %v1404_v17, %v1400_v24  ;;  %v756_v24 = vsub.f32 %v1960_v12, %v670_v42  ;;  %1425 = vpow2.f32 %v838_v22  ;;  %v2158_v11 = vpop.f32.mrf.mxu0  ;;  %v834_v17 = vmul.f32 1.442695, %v755_v19 }
 0x2ea   : > { %v947_v16 = vpack.c.bf16 %v1406_v31, %v1402_v26  ;;  %v1408_v0 = vpop.eup %1407  ;;  %v840_v26 = vmul.f32 1.442695, %v758_v57  ;;  %v658_v42 = vpop.xlane.xlu0 %657  ;;  %v754_v22 = vsub.f32 %v1955_v9, %v667_v15  ;;  %v752_v19 = vsub.f32 %v1950_v7, %v664_v53 }
 0x2eb   : > { %v836_v31 = vmul.f32 1.442695, %v756_v24  ;;  %v1049_v18 = vpop.f32.mrf.mxu0 }
 0x2ec   : > { %1058 = vmatprep.subr.bf16.mxu1 %v947_v16  ;;  %v1410_v46 = vpop.eup %1409  ;;  %v661_v16 = vpop.xlane.xlu1 %660  ;;  %1427 = vpow2.f32 %v840_v26  ;;  %v749_v18 = vsub.f32 %v1943_v3, %v658_v42  ;;  %v828_v26 = vmul.f32 1.442695, %v752_v19  ;;  %v748_v3 = vsub.f32 %v1940_v2, %v658_v42  ;;  %v2336_v2 = vld [vmem:[#allocation16_spill] sm:$0xff] }
 0x2ed   : > { %1059 = vmatpush1.bf16.xpose.msra.mxu1 %v946_v59  ;;  %v945_v52 = vpack.c.bf16 %v1410_v46, %v1408_v0  ;;  %v1412_v27 = vpop.eup %1411  ;;  %v1050_v8 = vpop.f32.mrf.mxu0  ;;  %1429 = vpow2.f32 %v834_v17  ;;  %v751_v57 = vsub.f32 %v1947_v6, %v661_v16  ;;  %v832_v46 = vmul.f32 1.442695, %v754_v22 }
 0x2ee   : > { %1431 = vpow2.f32 %v836_v31  ;;  %v652_v6 = vpop.xlane.xlu0 %651  ;;  %v820_v8 = vmul.f32 1.442695, %v748_v3 }
 0x2ef   : > { %1060 = vmatprep.subr.bf16.mxu1 %v945_v52  ;;  %1433 = vpow2.f32 %v830_v43  ;;  %v826_v14 = vmul.f32 1.442695, %v751_v57  ;;  %v745_v43 = vsub.f32 %v1933_v61, %v652_v6  ;;  %v2337_v61 = vld [vmem:[#allocation17_spill] sm:$0xff] }
 0x2f0   : > { %v1414_v39 = vpop.eup %1413  ;;  %v655_v9 = vpop.xlane.xlu1 %654  ;;  %1435 = vpow2.f32 %v832_v46 }
 0x2f1   : > { %v1416_v30 = vpop.eup %1415  ;;  %1437 = vpow2.f32 %v826_v14  ;;  %v747_v7 = vsub.f32 %v1937_v1, %v655_v9  ;;  %v746_v19 = vsub.f32 %v1935_v62, %v655_v9  ;;  %v2338_v14 = vld [vmem:[#allocation14_spill] sm:$0xff] }
 0x2f2   : > { %v1418_v12 = vpop.eup %1417  ;;  %v944_v59 = vpack.c.bf16 %v1412_v27, %v1416_v30  ;;  %v822_v27 = vmul.f32 1.442695, %v749_v18  ;;  %1439 = vpow2.f32 %v828_v26  ;;  %v646_v1 = vpop.xlane.xlu0 %645 }
 0x2f3   : > { %v943_v0 = vpack.c.bf16 %v1414_v39, %v1418_v12  ;;  %v1420_v24 = vpop.eup %1419  ;;  %v750_v39 = vsub.f32 %v1945_v4, %v661_v16  ;;  %v818_v22 = vmul.f32 1.442695, %v747_v7  ;;  %v814_v16 = vmul.f32 1.442695, %v745_v43  ;;  %v2339_v7 = vld [vmem:[#allocation15_spill] sm:$0xff] }
 0x2f4   : > { %v1422_v52 = vpop.eup %1421  ;;  %1441 = vpow2.f32 %v822_v27  ;;  %v649_v57 = vpop.xlane.xlu1 %648  ;;  %v816_v26 = vmul.f32 1.442695, %v746_v19  ;;  %v2341_v19 = vld [vmem:[#allocation26_spill] sm:$0xff] }
 0x2f5   : > { %1061 = vmatpush1.bf16.xpose.msra.mxu1 %v944_v59  ;;  %v1424_v15 = vpop.eup %1423  ;;  %v824_v30 = vmul.f32 1.442695, %v750_v39  ;;  %v743_v42 = vsub.f32 %v2336_v2, %v649_v57 }
 0x2f6   : > { %1062 = vmatprep.subr.bf16.mxu1 %v943_v0  ;;  %v1426_v17 = vpop.eup %1425  ;;  %v942_v31 = vpack.c.bf16 %v1420_v24, %v1424_v15  ;;  %v744_v24 = vsub.f32 %v2337_v61, %v652_v6  ;;  %v2340_v6 = vld [vmem:[#allocation13_spill] sm:$0xff] }
 0x2f7   : > { %v941_v53 = vpack.c.bf16 %v1422_v52, %v1426_v17  ;;  %1443 = vpow2.f32 %v824_v30  ;;  %v741_v52 = vsub.f32 %v2338_v14, %v646_v1  ;;  %v810_v27 = vmul.f32 1.442695, %v743_v42 }
 0x2f8   : > { %1445 = vpow2.f32 %v818_v22  ;;  %v812_v39 = vmul.f32 1.442695, %v744_v24  ;;  %v740_v30 = vsub.f32 %v2340_v6, %v646_v1 }
 0x2f9   : > { %v1428_v12 = vpop.eup %1427  ;;  %1447 = vpow2.f32 %v820_v8  ;;  %v806_v62 = vmul.f32 1.442695, %v741_v52 }
 0x2fa   : > { %v1430_v59 = vpop.eup %1429  ;;  %1449 = vpow2.f32 %v814_v16 }
 0x2fb   : > { %v1432_v4 = vpop.eup %1431  ;;  %1451 = vpow2.f32 %v816_v26 }
 0x2fc   : > { %v1434_v0 = vpop.eup %1433  ;;  %v940_v18 = vpack.c.bf16 %v1428_v12, %v1432_v4  ;;  %1453 = vpow2.f32 %v810_v27  ;;  %v804_v4 = vmul.f32 1.442695, %v740_v30 }
 0x2fd   : > { %1063 = vmatpush1.bf16.xpose.msra.mxu1 %v942_v31  ;;  %v939_v46 = vpack.c.bf16 %v1430_v59, %v1434_v0  ;;  %v1436_v15 = vpop.eup %1435  ;;  %1455 = vpow2.f32 %v812_v39 }
 0x2fe   : > { %1064 = vmatprep.subr.bf16.mxu1 %v941_v53  ;;  %v1438_v17 = vpop.eup %1437  ;;  %v742_v53 = vsub.f32 %v2339_v7, %v649_v57  ;;  %1457 = vpow2.f32 %v806_v62 }
 0x2ff   : > { %v1440_v31 = vpop.eup %1439 }
 0x300   : > { %v938_v3 = vpack.c.bf16 %v1436_v15, %v1440_v31  ;;  %v808_v12 = vmul.f32 1.442695, %v742_v53 }
 0x301   : > { %v1442_v9 = vpop.eup %1441 }
 0x302   : > { %v937_v43 = vpack.c.bf16 %v1438_v17, %v1442_v9  ;;  %1459 = vpow2.f32 %v808_v12 }
 0x303   : > { %1461 = vpow2.f32 %v804_v4 }
 0x304   : > { %v1444_v22 = vpop.eup %1443 }
 0x305   : > { %1065 = vmatpush1.bf16.xpose.msra.mxu1 %v940_v18  ;;  %v1446_v8 = vpop.eup %1445 }
 0x306   : > { %1066 = vmatprep.subr.bf16.mxu1 %v939_v46  ;;  %v1448_v0 = vpop.eup %1447 }
 0x307   : > { %v1450_v57 = vpop.eup %1449  ;;  %v936_v2 = vpack.c.bf16 %v1444_v22, %v1448_v0 }
 0x308   : > { %v935_v42 = vpack.c.bf16 %v1446_v8, %v1450_v57  ;;  %v1452_v15 = vpop.eup %1451 }
 0x309   : > { %v1454_v39 = vpop.eup %1453 }
 0x30a   : > { %v1456_v31 = vpop.eup %1455 }
 0x30b   : > { %v1458_v9 = vpop.eup %1457 }
 0x30d   : > { %1067 = vmatpush1.bf16.xpose.msra.mxu1 %v938_v3  ;;  %v934_v3 = vpack.c.bf16 %v1452_v15, %v1456_v31 }
 0x30e   : > { %1068 = vmatprep.subr.bf16.mxu1 %v937_v43 }
 0x30f   : > { %v1460_v22 = vpop.eup %1459 }
 0x310   : > { %v1462_v4 = vpop.eup %1461 }
 0x312   : > { %v736_v59 = vpop.xlane.xlu0 %735 }
 0x313   : > { %v800_v16 = vsub.f32 %v2080_v49, %v736_v59  ;;  %v801_v18 = vsub.f32 %v2341_v19, %v736_v59 }
 0x315   : > { %v924_v1 = vmul.f32 1.442695, %v800_v16  ;;  %1069 = vmatpush1.bf16.xpose.msra.mxu1 %v936_v2  ;;  %v926_v14 = vmul.f32 1.442695, %v801_v18 }
 0x316   : > { %v730_v46 = vpop.xlane.xlu0 %729  ;;  %v739_v61 = vpop.xlane.xlu1 %738  ;;  %1070 = vmatprep.subr.bf16.mxu1 %v935_v42 }
 0x317   : > { %v802_v24 = vsub.f32 %v2086_v63, %v739_v61  ;;  %v803_v52 = vsub.f32 %v2088_v56, %v739_v61  ;;  %v797_v49 = vsub.f32 %v2074_v44, %v730_v46  ;;  %1463 = vpow2.f32 %v924_v1 }
 0x318   : > { %1465 = vpow2.f32 %v926_v14  ;;  %v933_v44 = vpack.c.bf16 %v1454_v39, %v1458_v9  ;;  %v796_v6 = vsub.f32 %v2072_v41, %v730_v46  ;;  %v932_v41 = vpack.c.bf16 %v1460_v22, %v1462_v4 }
 0x319   : > { %v928_v26 = vmul.f32 1.442695, %v802_v24  ;;  %v930_v27 = vmul.f32 1.442695, %v803_v52  ;;  %v918_v7 = vmul.f32 1.442695, %v797_v49 }
 0x31a   : > { %v733_v17 = vpop.xlane.xlu1 %732  ;;  %v724_v63 = vpop.xlane.xlu0 %723  ;;  %v916_v8 = vmul.f32 1.442695, %v796_v6 }
 0x31b   : > { %v799_v62 = vsub.f32 %v2078_v48, %v733_v17  ;;  %1467 = vpow2.f32 %v928_v26  ;;  %v798_v53 = vsub.f32 %v2076_v45, %v733_v17  ;;  %v793_v30 = vsub.f32 %v2066_v36, %v724_v63 }
 0x31c   : > { %1469 = vpow2.f32 %v930_v27 }
 0x31d   : > { %v922_v56 = vmul.f32 1.442695, %v799_v62  ;;  %1071 = vmatpush1.bf16.xpose.msra.mxu1 %v934_v3  ;;  %1471 = vpow2.f32 %v918_v7  ;;  %v920_v48 = vmul.f32 1.442695, %v798_v53  ;;  %v910_v16 = vmul.f32 1.442695, %v793_v30 }
 0x31e   : > { %v727_v43 = vpop.xlane.xlu1 %726  ;;  %1072 = vmatprep.subr.bf16.mxu1 %v933_v44  ;;  %v718_v0 = vpop.xlane.xlu0 %717 }
 0x31f   : > { %v795_v12 = vsub.f32 %v2070_v40, %v727_v43  ;;  %1473 = vpow2.f32 %v922_v56  ;;  %v794_v19 = vsub.f32 %v2068_v37, %v727_v43  ;;  %v792_v40 = vsub.f32 %v2064_v33, %v724_v63 }
 0x320   : > { %1475 = vpow2.f32 %v920_v48  ;;  %v789_v57 = vsub.f32 %v2058_v28, %v718_v0  ;;  %v788_v27 = vsub.f32 %v2056_v25, %v718_v0  ;;  %v2342_v0 = vld [vmem:[#allocation25_spill] sm:$0xff] }
 0x321   : > { %v914_v59 = vmul.f32 1.442695, %v795_v12  ;;  %v912_v42 = vmul.f32 1.442695, %v794_v19  ;;  %v908_v24 = vmul.f32 1.442695, %v792_v40 }
 0x322   : > { %v721_v45 = vpop.xlane.xlu1 %720  ;;  %v902_v37 = vmul.f32 1.442695, %v789_v57  ;;  %v2345_v57 = vld [vmem:[#allocation21_spill] sm:$0xff] }
 0x323   : > { %1477 = vpow2.f32 %v914_v59  ;;  %v791_v36 = vsub.f32 %v2062_v32, %v721_v45  ;;  %v712_v32 = vpop.xlane.xlu0 %711  ;;  %v790_v26 = vsub.f32 %v2060_v29, %v721_v45  ;;  %v900_v29 = vmul.f32 1.442695, %v788_v27 }
 0x324   : > { %1479 = vpow2.f32 %v916_v8  ;;  %v1464_v18 = vpop.eup %1463  ;;  %v785_v17 = vsub.f32 %v2048_v55, %v712_v32  ;;  %v784_v6 = vsub.f32 %v2046_v54, %v712_v32  ;;  %v2343_v54 = vld [vmem:[#allocation23_spill] sm:$0xff] }
 0x325   : > { %1073 = vmatpush1.bf16.xpose.msra.mxu1 %v932_v41  ;;  %1481 = vpow2.f32 %v910_v16  ;;  %v1466_v2 = vpop.eup %1465  ;;  %v906_v61 = vmul.f32 1.442695, %v791_v36  ;;  %v904_v31 = vmul.f32 1.442695, %v790_v26  ;;  %v2346_v26 = vld [vmem:[#allocation22_spill] sm:$0xff] }
 0x326   : > { %v715_v14 = vpop.xlane.xlu1 %714  ;;  %1483 = vpow2.f32 %v912_v42  ;;  %v894_v3 = vmul.f32 1.442695, %v785_v17  ;;  %v892_v8 = vmul.f32 1.442695, %v784_v6  ;;  %v2347_v17 = vld [vmem:[#allocation20_spill] sm:$0xff] }
 0x327   : > { %1485 = vpow2.f32 %v906_v61  ;;  %v787_v15 = vsub.f32 %v2054_v10, %v715_v14  ;;  %v706_v56 = vpop.xlane.xlu0 %705  ;;  %v786_v44 = vsub.f32 %v2052_v5, %v715_v14 }
 0x328   : > { %v1468_v46 = vpop.eup %1467  ;;  %1487 = vpow2.f32 %v908_v24  ;;  %v781_v30 = vsub.f32 %v2032_v47, %v706_v56  ;;  %v2344_v47 = vld [vmem:[#allocation24_spill] sm:$0xff] }
 0x329   : > { %v1470_v1 = vpop.eup %1469  ;;  %v962_v49 = vpack.c.bf16 %v1468_v46, %v1464_v18  ;;  %1489 = vpow2.f32 %v902_v37  ;;  %v898_v9 = vmul.f32 1.442695, %v787_v15  ;;  %v896_v12 = vmul.f32 1.442695, %v786_v44 }
 0x32a   : > { %v963_v52 = vpack.c.bf16 %v1470_v1, %v1466_v2  ;;  %v1472_v33 = vpop.eup %1471  ;;  %v709_v63 = vpop.xlane.xlu1 %708  ;;  %1491 = vpow2.f32 %v904_v31  ;;  %v886_v4 = vmul.f32 1.442695, %v781_v30  ;;  %v780_v18 = vsub.f32 %v2344_v47, %v706_v56  ;;  %v2348_v31 = vld [vmem:[#allocation19_spill] sm:$0xff] }
 0x32b   : > { %1493 = vpow2.f32 %v898_v9  ;;  %v783_v43 = vsub.f32 %v2040_v51, %v709_v63  ;;  %v700_v51 = vpop.xlane.xlu0 %699  ;;  %v782_v19 = vsub.f32 %v2342_v0, %v709_v63  ;;  %v2351_v47 = vpack.c.bf16 %v2144_v50, %v2139_v60 }
 0x32c   : > { %1074 = vmatprep.subr.bf16.mxu1 %v963_v52  ;;  %v1474_v28 = vpop.eup %1473  ;;  %1495 = vpow2.f32 %v900_v29  ;;  %v777_v2 = vsub.f32 %v2345_v57, %v700_v51  ;;  %v884_v24 = vmul.f32 1.442695, %v780_v18  ;;  %v1056_v18 = vpack.c.bf16 %v2155_v38, %v2155_v38 }
 0x32d   : > { %1075 = vmatpush2.bf16.xpose.msra.mxu1 %v962_v49  ;;  %v961_v39 = vpack.c.bf16 %v1474_v28, %v1472_v33  ;;  %v1476_v62 = vpop.eup %1475  ;;  %1497 = vpow2.f32 %v894_v3  ;;  %v890_v22 = vmul.f32 1.442695, %v783_v43  ;;  %v888_v42 = vmul.f32 1.442695, %v782_v19  ;;  %v2349_v43 = vld [vmem:[#allocation18_spill] sm:$0xff] }
 0x32e   : > { %v703_v45 = vpop.xlane.xlu1 %702  ;;  %1499 = vpow2.f32 %v896_v12  ;;  %v878_v52 = vmul.f32 1.442695, %v777_v2 }
 0x32f   : > { %1076 = vmatprep.subr.bf16.mxu1 %v961_v39  ;;  %1501 = vpow2.f32 %v890_v22  ;;  %v779_v36 = vsub.f32 %v2343_v54, %v703_v45  ;;  %v694_v32 = vpop.xlane.xlu0 %693  ;;  %v778_v33 = vsub.f32 %v2346_v26, %v703_v45  ;;  %v776_v39 = vsub.f32 %v2347_v17, %v700_v51 }
 0x330   : > { %v1478_v7 = vpop.eup %1477  ;;  %1503 = vpow2.f32 %v892_v8 }
 0x331   : > { %v1480_v53 = vpop.eup %1479  ;;  %1505 = vpow2.f32 %v886_v4  ;;  %v882_v61 = vmul.f32 1.442695, %v779_v36  ;;  %v880_v9 = vmul.f32 1.442695, %v778_v33  ;;  %v2350_v36 = vpack.c.bf16 %v2147_v13, %v2142_v20 }
 0x332   : > { %v1482_v10 = vpop.eup %1481  ;;  %v960_v25 = vpack.c.bf16 %v1476_v62, %v1480_v53  ;;  %v697_v14 = vpop.xlane.xlu1 %696  ;;  %1507 = vpow2.f32 %v888_v42  ;;  %v773_v62 = vsub.f32 %v2348_v31, %v694_v32  ;;  %v876_v53 = vmul.f32 1.442695, %v776_v39 }
 0x333   : > { %v959_v55 = vpack.c.bf16 %v1478_v7, %v1482_v10  ;;  %v1484_v48 = vpop.eup %1483  ;;  %1509 = vpow2.f32 %v882_v61  ;;  %v775_v28 = vsub.f32 %v2008_v35, %v697_v14  ;;  %v774_v35 = vsub.f32 %v2006_v34, %v697_v14 }
 0x334   : > { %v1486_v59 = vpop.eup %1485  ;;  %1511 = vpow2.f32 %v884_v24  ;;  %v870_v10 = vmul.f32 1.442695, %v773_v62  ;;  %v1121_v61 = vlaneseq }
 0x335   : > { %1077 = vmatpush2.bf16.xpose.msra.mxu1 %v960_v25  ;;  %v1488_v5 = vpop.eup %1487  ;;  %1513 = vpow2.f32 %v878_v52  ;;  %v874_v29 = vmul.f32 1.442695, %v775_v28  ;;  %v872_v6 = vmul.f32 1.442695, %v774_v35  ;;  %v1138_v52 = vstv %s1137_s22  ;;  %v1534_v35 = vld [vmem:[%s1859_s11 + $0x30] sm:$0xff] }
 0x336   : > { %1078 = vmatprep.subr.bf16.mxu1 %v959_v55  ;;  %v1490_v16 = vpop.eup %1489  ;;  %v958_v41 = vpack.c.bf16 %v1484_v48, %v1488_v5  ;;  %1515 = vpow2.f32 %v880_v9  ;;  %v772_v55 = vsub.f32 %v2349_v43, %v694_v32 }
 0x337   : > { %v957_v40 = vpack.c.bf16 %v1486_v59, %v1490_v16  ;;  %v1492_v46 = vpop.eup %1491  ;;  %1517 = vpow2.f32 %v874_v29  ;;  %v1531_v29 = vld [vmem:[%s1859_s11] sm:$0xff] }
 0x338   : > { %v1494_v1 = vpop.eup %1493  ;;  %1519 = vpow2.f32 %v876_v53  ;;  %v868_v48 = vmul.f32 1.442695, %v772_v55  ;;  %v1532_v53 = vld [vmem:[%s1859_s11 + $0x10] sm:$0xff] }
 0x339   : > { %v1496_v37 = vpop.eup %1495  ;;  %1521 = vpow2.f32 %v870_v10  ;;  %v1533_v10 = vld [vmem:[%s1859_s11 + $0x20] sm:$0xff] }
 0x33a   : > { %v1498_v49 = vpop.eup %1497  ;;  %v956_v15 = vpack.c.bf16 %v1492_v46, %v1496_v37  ;;  %1523 = vpow2.f32 %v872_v6 }
 0x33b   : > { %v955_v27 = vpack.c.bf16 %v1494_v1, %v1498_v49  ;;  %v1500_v7 = vpop.eup %1499  ;;  %1525 = vpow2.f32 %v868_v48  ;;  %v1122_v1 = vshrl.u32 %v1121_v61, 7  ;;  %v1536_v48 = vld [vmem:[%s1859_s11 + $0x18] sm:$0xff] }
 0x33c   : > { %v1502_v63 = vpop.eup %1501 }
 0x33d   : > { %1079 = vmatpush2.bf16.xpose.msra.mxu1 %v958_v41  ;;  %v1504_v3 = vpop.eup %1503  ;;  %v1123_v38 = vsub.s32 0, %v1122_v1 }
 0x33e   : > { %1080 = vmatprep.subr.bf16.mxu1 %v957_v40  ;;  %v1506_v56 = vpop.eup %1505  ;;  %v954_v44 = vpack.c.bf16 %v1500_v7, %v1504_v3  ;;  %v1057_v40 = vpack.c.bf16 %v2158_v11, %v2158_v11 }
 0x33f   : > { %v953_v25 = vpack.c.bf16 %v1502_v63, %v1506_v56  ;;  %v1508_v30 = vpop.eup %1507 }
 0x340   : > { %v1510_v12 = vpop.eup %1509 }
 0x341   : > { %v1512_v22 = vpop.eup %1511 }
 0x342   : > { %v1514_v59 = vpop.eup %1513  ;;  %v952_v8 = vpack.c.bf16 %v1508_v30, %v1512_v22  ;;  %v1535_v30 = vld [vmem:[%s1859_s11 + $0x8] sm:$0xff] }
 0x343   : > { %v951_v45 = vpack.c.bf16 %v1510_v12, %v1514_v59  ;;  %v1516_v34 = vpop.eup %1515  ;;  %v1537_v59 = vld [vmem:[%s1859_s11 + $0x28] sm:$0xff] }
 0x344   : > { %v1518_v5 = vpop.eup %1517 }
 0x345   : > { %1081 = vmatpush2.bf16.xpose.msra.mxu1 %v956_v15  ;;  %v1520_v4 = vpop.eup %1519 }
 0x346   : > { %1082 = vmatprep.subr.bf16.mxu1 %v955_v27  ;;  %v1522_v16 = vpop.eup %1521  ;;  %v950_v51 = vpack.c.bf16 %v1516_v34, %v1520_v4 }
 0x347   : > { %v949_v0 = vpack.c.bf16 %v1518_v5, %v1522_v16  ;;  %v1524_v19 = vpop.eup %1523 }
 0x348   : > { %v1526_v41 = vpop.eup %1525 }
 0x349   : > { %v948_v54 = vpack.c.bf16 %v1524_v19, %v1526_v41 }
 0x34d   : > { %1083 = vmatpush2.bf16.xpose.msra.mxu1 %v954_v44 }
 0x34e   : > { %1084 = vmatprep.subr.bf16.mxu1 %v953_v25 }
 0x355   : > { %1085 = vmatpush2.bf16.xpose.msra.mxu1 %v952_v8 }
 0x356   : > { %1086 = vmatprep.subr.bf16.mxu1 %v951_v45  ;;  %v1538_v45 = vld [vmem:[%s1859_s11 + $0x38] sm:$0xff] }
 0x35d   : > { %1087 = vmatpush2.bf16.xpose.msra.mxu1 %v950_v51 }
 0x35e   : > { %1088 = vmatprep.subr.bf16.mxu1 %v949_v0 }
 0x365   : > { %1089 = vmatpush2.bf16.xpose.msra.mxu1 %v948_v54 }
 0x36c   : > { %1091 = vmatmul.mubr.bf16.vlgmr.msra.gmra.mxu1 %v1052_v21 }
 0x36d   : > { %1100 = vmatprep.mubr.bf16.mxu1 %v2350_v36 }
 0x374   : > { %1101 = vmatmul.mubr.bf16.gmra.mxu1 %v2351_v47 }
 0x375   : > { %1110 = vmatprep.mubr.bf16.mxu1 %v1057_v40 }
 0x37c   : > { %1111 = vmatmul.mubr.bf16.gmra.mxu1 %v1056_v18 }
 0x42c   : > { %v1092_v57 = vpop.f32.mrf.mxu1 }
 0x42e   : > { %v1094_v2 = vpop.f32.mrf.mxu1 }
 0x430   : > { %v1096_v23 = vpop.f32.mrf.mxu1 }
 0x432   : > { %v1098_v58 = vpop.f32.mrf.mxu1 }
 0x434   : > { %v1102_v21 = vpop.f32.mrf.mxu1 }
 0x436   : > { %v1104_v20 = vpop.f32.mrf.mxu1 }
 0x438   : > { %v1106_v13 = vpop.f32.mrf.mxu1 }
 0x43a   : > { %v1108_v42 = vpop.f32.mrf.mxu1 }
 0x43c   : > { %v1112_v46 = vpop.f32.mrf.mxu1 }
 0x43d   : > { %1527 = vrcp.f32 %v1112_v46 }
 0x43e   : > { %v1114_v11 = vpop.f32.mrf.mxu1 }
 0x43f   : > { %1529 = vrcp.f32 %v1114_v11 }
 0x440   : > { %v1116_v60 = vpop.f32.mrf.mxu1 }
 0x442   : > { %v1117_v50 = vpop.f32.mrf.mxu1 }
 0x44a   : > { %v1528_v24 = vpop.eup %1527 }
 0x44b   : > { %v1124_v14 = vrot.slane %v1528_v24, %v1123_v38 }
 0x44c   : > { %v1530_v37 = vpop.eup %1529 }
 0x44d   : > { %v1129_v49 = vmul.f32 %v1124_v14, %v1092_v57  ;;  %v1131_v32 = vmul.f32 %v1124_v14, %v1096_v23  ;;  %v1133_v26 = vmul.f32 %v1124_v14, %v1102_v21  ;;  %v1135_v33 = vmul.f32 %v1124_v14, %v1106_v13 }
 0x44e   : > { %v1128_v15 = vrot.slane %v1530_v37, %v1123_v38 }
 0x44f   : > { %v1139_v28 = vmul.f32 %v1138_v52, %v1129_v49  ;;  %v1141_v27 = vmul.f32 %v1138_v52, %v1131_v32  ;;  %v1143_v17 = vmul.f32 %v1138_v52, %v1133_v26  ;;  %v1145_v39 = vmul.f32 %v1138_v52, %v1135_v33 }
 0x450   : > { %v1130_v31 = vmul.f32 %v1128_v15, %v1094_v2  ;;  %v1132_v62 = vmul.f32 %v1128_v15, %v1098_v58  ;;  %v1134_v9 = vmul.f32 %v1128_v15, %v1104_v20  ;;  %v1136_v7 = vmul.f32 %v1128_v15, %v1108_v42 }
 0x451   : > { %v1147_v63 = vadd.f32 %v1531_v29, %v1139_v28  ;;  %v1149_v3 = vadd.f32 %v1532_v53, %v1141_v27  ;;  %v1151_v56 = vadd.f32 %v1533_v10, %v1143_v17  ;;  %v1153_v44 = vadd.f32 %v1534_v35, %v1145_v39 }
 0x452   : > { %v1140_v25 = vmul.f32 %v1138_v52, %v1130_v31  ;;  %v1142_v43 = vmul.f32 %v1138_v52, %v1132_v62  ;;  %v1144_v55 = vmul.f32 %v1138_v52, %v1134_v9  ;;  %v1146_v6 = vmul.f32 %v1138_v52, %v1136_v7 }
 0x453   : > { %1155 = vst [vmem:[%s2221_s30] sm:$0xff] %v1147_v63  ;;  %1157 = vst [vmem:[%s2221_s30 + $0x10] sm:$0xff] %v1149_v3 }
 0x454   : > { %1159 = vst [vmem:[%s2221_s30 + $0x20] sm:$0xff] %v1151_v56  ;;  %1161 = vst [vmem:[%s2221_s30 + $0x30] sm:$0xff] %v1153_v44  ;;  %v1148_v12 = vadd.f32 %v1535_v30, %v1140_v25  ;;  %v1150_v22 = vadd.f32 %v1536_v48, %v1142_v43  ;;  %v1152_v8 = vadd.f32 %v1537_v59, %v1144_v55 }
 0x455   : > { %v1154_v34 = vadd.f32 %v1538_v45, %v1146_v6 }
 0x456   : > { %1156 = vst [vmem:[%s2221_s30 + $0x8] sm:$0xff] %v1148_v12  ;;  %1158 = vst [vmem:[%s2221_s30 + $0x18] sm:$0xff] %v1150_v22 }
 0x457   : > { %1160 = vst [vmem:[%s2221_s30 + $0x28] sm:$0xff] %v1152_v8  ;;  %1162 = vst [vmem:[%s2221_s30 + $0x38] sm:$0xff] %v1154_v34 }
 0x458   : > { %1632 = shalt.err (!%p1629_p9)
}
 0x459   : > { %s1633_s29 = scalar_lea.hbm %s2235_s13, 1024  ;;  %s1637_s10 = scalar_lea.hbm %s2292_s4, 2048 }
 0x45a   : > { %p1634_p13 = scmp.ne.s32.totalorder %s2235_s13, %s1633_s29  ;;  %p1638_p4 = scmp.lt.s32.totalorder %s2235_s13, %s2292_s4 }
 0x45b   : > { %p1639_p8 = scmp.lt.s32.totalorder %s1637_s10, %s1633_s29 }
 0x45c   : > { %p1635_p5 = pnand %p1634_p13, %p2352_p10 }
 0x45d   : > { %p1640_p3 = por %p1639_p8, %p1638_p4 }
 0x45e   : > { %p1636_p0 = pneg %p1635_p5 }
 0x460   : > { %p1641_p11 = pnand %p1640_p3, %p1636_p0 }
 0x462   : > { %1644 = shalt.err (!%p1641_p11)
}
 0x463   : > { %s1698_s24 = smov 256   ;;  %s1699_s27 = smov 16  }
 0x464   : > { %1329 = dma.vmem_to_hbm [thread:$0]  (%p2352_p10), %s2237_s6, 1024, %s2235_s13, %s1164_s14, %s1698_s24, %s1698_s24, %s1699_s27  }
 0x465 PF: > { %s1192_s30 = sand.u32 1, %s1675_s17   ;;  %p2353_p1 = scmp.ne.s32.totalorder %s2312_s23, 0 }
 0x466   : > { %p2354_p2 = scmp.ge.s32.totalorder %s1687_s20, 2  ;;  %s1193_s3 = scalar_lea.sflag [#allocation5], %s1192_s30 }
 0x468   : > { %p1343_p6 = pnand %p2354_p2, %p2353_p1 }
 0x46a   : > { %p1344_p12 = pneg %p1343_p6 }
 0x46c   : > { %1670 = dma.done.wait (%p1344_p12), %s1193_s3, 1024  }
 0x46d   : > { %1672 = vsyncadd (%p1344_p12), %s1193_s3, 4294966272  ;;  %p19_p7 = scmp.ge.s32.totalorder %s1800_s12, 4   ;;  %s2355_s17 = smov %s1679_s18 }
 0x46e   : > { %s2356_s18 = smov %s1683_s19  ;;  %s2357_s19 = smov %s1816_s16 }
 0x46f   : > { %s2358_s20 = smov %s1800_s12  ;;  %21 = sbr.rel (!%p19_p7) target bundleno = 8 (0x8), region = 89 }
 0x474   :  { %1198 = vsyncpa [#allocation4], 1 }
 0x475   :  { %1200 = vsyncpa [#allocation4 + $0x1], 1 }
 0x476   :  { %1201 = vsyncpa [#allocation7], 1 }
 0x477   :  { %1202 = vsyncpa [#allocation5], 1 }
 0x478   :  { %1204 = vsyncpa [#allocation5 + $0x1], 1 }

</bundles_post_ra>
